<compile_context>
chip_gen: v7x
topology: tpu7x:2x2x1
jax: 0.10.0
libtpu: 0.0.40
codegen_flags: <defaults>
</compile_context>

<pallas_src>
import functools

import jax
import jax.numpy as jnp
from jax import lax
from jax.experimental import pallas as pl
from jax.experimental.pallas import tpu as pltpu


_MASK_VALUE = 3.0e38  # large finite f32: padded channel columns drop out of row-min & softmax


def _round_up(x, m):
    return (x + m - 1) // m * m


def _pick_row_tile(c_padded, max_tile, align):
    tc = min(c_padded, max(align, (max_tile // align) * align))
    while c_padded % tc != 0:
        tc -= align
    return tc


def _cam_kernel(gamma_ref, x_full_ref, o_ref, *scratch, channels, tc, mxu_dtype):
    # x_full_ref : (Cp, Np) f32 -- all (padded) channels, resident across the c axis.
    c_idx = pl.program_id(1)
    row0 = pl.multiple_of(c_idx * tc, tc)

    cp = x_full_ref.shape[0]
    use_bf16 = mxu_dtype != jnp.float32

    if use_bf16:
        xmx_ref = scratch[0]
        # Cast the resident block once per batch (c axis is "arbitrary" and runs
        # in order on one core, so c_idx == 0 is the first step of every batch).
        @pl.when(c_idx == 0)
        def _():
            xmx_ref[...] = x_full_ref[...].astype(mxu_dtype)
        xf_mx = xmx_ref[...]                                  # (Cp, Np) bf16
        xr_mx = xmx_ref[pl.ds(row0, tc), :]                   # (tc, Np) bf16
        prec = None
    else:
        xf_mx = x_full_ref[...]                               # (Cp, Np) f32
        xr_mx = x_full_ref[pl.ds(row0, tc), :]                # (tc, Np) f32
        prec = lax.Precision.HIGHEST

    # energy[i, j] = <x[row0 + i], x[j]>  (contract over the spatial axis)
    energy = lax.dot_general(
        xr_mx, xf_mx,
        dimension_numbers=(((1,), (1,)), ((), ())),
        preferred_element_type=jnp.float32,
        precision=prec,
    )                                                         # (tc, Cp) f32

    if cp != channels:
        # Mask padded channel columns so they do not affect row-min / softmax sum.
        col = lax.broadcasted_iota(jnp.int32, energy.shape, 1)
        energy = jnp.where(col < channels, energy, _MASK_VALUE)

    # softmax(rowmax(E) - E) == exp(rowmin(E) - E) / sum(exp(rowmin(E) - E))
    row_min = jnp.min(energy, axis=-1, keepdims=True)         # (tc, 1)
    p = jnp.exp(row_min - energy)                             # (tc, Cp), all args <= 0
    denom = jnp.sum(p, axis=-1, keepdims=True)                # (tc, 1)
    if use_bf16:
        attn = p * pl.reciprocal(denom, approx=True)          # EUP vrcp, ~free
    else:
        attn = p / denom                                      # exact for the f32 path

    out = lax.dot_general(
        attn.astype(mxu_dtype), xf_mx,
        dimension_numbers=(((1,), (0,)), ((), ())),
        preferred_element_type=jnp.float32,
        precision=prec,
    )                                                         # (tc, Np) f32

    x_rows = x_full_ref[pl.ds(row0, tc), :]                   # exact f32 residual rows
    gamma = gamma_ref[0]
    o_ref[...] = (gamma * out + x_rows).astype(o_ref.dtype)


def cam_forward(x, gamma, *, mxu_dtype=jnp.bfloat16, max_row_tile=256,
                vmem_cap_bytes=96 << 20):
    """x: (B, C, H, W) float32, gamma: (1,) float32 (the Scale(0) parameter).

    vmem_cap_bytes defaults to ~96 MiB (good for v5e/v6e's 128 MiB VMEM); pass
    ~56 MiB on v7x (64 MiB physical VMEM).
    """
    B, C, H, W = x.shape
    N = H * W

    # Lane/sublane-aligned padding. Zero spatial columns add nothing to the inner
    # products (exact); padded channels are masked inside the kernel (exact).
    c_align = 16 if mxu_dtype == jnp.bfloat16 else 8
    Cp = _round_up(C, c_align)
    Np = _round_up(N, 128)

    x_flat = x.reshape(B, C, N)
    if (Cp, Np) != (C, N):
        # TODO(synk): unaligned C / H*W costs an extra pad pass + slice pass over x
        # in an HBM-bound op; consumers with aligned shapes skip this entirely.
        x_flat = jnp.pad(x_flat, ((0, 0), (0, Cp - C), (0, Np - N)))

    itemsize = x.dtype.itemsize
    use_bf16 = mxu_dtype != jnp.float32

    def footprint(tc):
        full_blk = 2 * Cp * Np * itemsize            # double-buffered resident x block
        out_blk = 2 * tc * Np * itemsize             # double-buffered output tile
        scratch = Cp * Np * 2 if use_bf16 else 0     # per-batch bf16 cast of x
        interm = 4 * tc * Cp * 4 + 2 * tc * Np * 4   # energy/p/attn + out/rows temporaries
        return full_blk + out_blk + scratch + interm

    tc = _pick_row_tile(Cp, max_row_tile, c_align)
    while tc > c_align and footprint(tc) + (4 << 20) > vmem_cap_bytes:
        tc = _pick_row_tile(Cp, tc - c_align, c_align)
    # TODO(synk): very large C*H*W (resident block alone over the cap) needs an
    # N-chunked energy-accumulation path; not implemented here.
    vmem_limit = int(min(max(footprint(tc) + (8 << 20), 32 << 20), vmem_cap_bytes))

    cost = pl.CostEstimate(
        flops=4 * B * Cp * Cp * Np,
        transcendentals=B * Cp * Cp,
        bytes_accessed=2 * B * Cp * Np * itemsize + gamma.size * gamma.dtype.itemsize,
    )

    kernel = functools.partial(_cam_kernel, channels=C, tc=tc, mxu_dtype=mxu_dtype)
    scratch_shapes = [pltpu.VMEM((Cp, Np), mxu_dtype)] if use_bf16 else []

    out_flat = pl.pallas_call(
        kernel,
        out_shape=jax.ShapeDtypeStruct((B, Cp, Np), x.dtype),
        grid_spec=pltpu.PrefetchScalarGridSpec(
            num_scalar_prefetch=0,
            grid=(B, Cp // tc),
            in_specs=[
                pl.BlockSpec(memory_space=pltpu.SMEM),                  # gamma scalar
                pl.BlockSpec((None, Cp, Np), lambda b, c: (b, 0, 0)),   # full x, resident over c
            ],
            out_specs=pl.BlockSpec((None, tc, Np), lambda b, c: (b, c, 0)),
            scratch_shapes=scratch_shapes,
        ),
        compiler_params=pltpu.CompilerParams(
            # Megacore splits on the batch axis; c axis stays in-order on one core
            # so the per-batch scratch cast and resident full-x block are correct
            # and the dominant HBM read happens once per batch per owning core.
            dimension_semantics=("parallel", "arbitrary"),
            vmem_limit_bytes=vmem_limit,
        ),
        cost_estimate=cost,
    )(gamma, x_flat)

    return out_flat[:, :C, :N].reshape(B, C, H, W)


def cam_reference(x, gamma, *, mxu_dtype=jnp.float32):
    """Pure-JAX reference mirroring the PyTorch forward.

    mxu_dtype lets the reference mirror the kernel's deliberate bf16-operand /
    f32-accumulate matmul precision so comparisons isolate structural bugs.
    """
    B, C, H, W = x.shape
    prec = lax.Precision.HIGHEST if mxu_dtype == jnp.float32 else lax.Precision.DEFAULT
    q = x.reshape(B, C, -1).astype(mxu_dtype)
    energy = jnp.einsum("bcn,bdn->bcd", q, q,
                        preferred_element_type=jnp.float32, precision=prec)
    energy_new = jnp.max(energy, axis=-1, keepdims=True) - energy
    attn = jax.nn.softmax(energy_new, axis=-1)
    out = jnp.einsum("bcd,bdn->bcn", attn.astype(mxu_dtype), q,
                     preferred_element_type=jnp.float32, precision=prec)
    return gamma[0] * out.reshape(B, C, H, W) + x


if __name__ == "__main__":
    key = jax.random.PRNGKey(0)
    B, C, H, W = 2, 4, 16, 16
    x = jax.random.normal(key, (B, C, H, W), dtype=jnp.float32)

    # Scale(0): learnable scalar gamma, deterministically initialized to 0.
    gamma0 = jnp.zeros((1,), dtype=jnp.float32)
    out0 = jax.block_until_ready(cam_forward(x, gamma0))
    assert out0.shape == (B, C, H, W)
    # gamma == 0  =>  output must reduce exactly to the residual input
    # (residual rows come from the exact f32 resident block).
    assert jnp.allclose(out0, x, atol=1e-6, rtol=0.0), "gamma=0 path mismatch"

    gamma = jnp.array([0.7], dtype=jnp.float32)

    # Default bf16-MXU / f32-accumulate path, checked against a reference that
    # mirrors the same matmul precision (isolates structural correctness).
    out_bf16 = jax.block_until_ready(cam_forward(x, gamma))
    ref_bf16 = cam_reference(x, gamma, mxu_dtype=jnp.bfloat16)
    assert jnp.allclose(out_bf16, ref_bf16, atol=3e-2, rtol=2e-2), \
        "mismatch vs reference (bf16 MXU path)"

    # Full-f32 MXU path (exact division, HIGHEST precision) matches tightly.
    out_f32 = jax.block_until_ready(cam_forward(x, gamma, mxu_dtype=jnp.float32))
    ref_f32 = cam_reference(x, gamma, mxu_dtype=jnp.float32)
    assert jnp.allclose(out_f32, ref_f32, atol=1e-3, rtol=1e-3), \
        "mismatch vs reference (f32 MXU path)"

    print("KERNEL_OK")
</pallas_src>

<mosaic_0001>
module attributes {stable_mosaic.version = 11 : i64} {
  func.func @_cam_kernel(%arg0: i32, %arg1: i32, %arg2: memref<1xf32, #tpu.memory_space<smem>>, %arg3: memref<1x16x256xf32, #tpu.memory_space<vmem>>, %arg4: memref<1x16x256xf32, #tpu.memory_space<vmem>>, %arg5: memref<16x256xbf16, #tpu.memory_space<vmem>>) attributes {dimension_semantics = [#tpu.dimension_semantics<parallel>, #tpu.dimension_semantics<arbitrary>], iteration_bounds = array<i64: 2, 1>, scalar_prefetch = 0 : i64, scratch_operands = 1 : i64, tpu.core_type = #tpu.core_type<tc>, window_params = [{transform_indices = @transform_0, window_bounds = array<i64: 1>}, {transform_indices = @transform_1, window_bounds = array<i64: 1, 16, 256>}, {transform_indices = @transform_2, window_bounds = array<i64: 1, 16, 256>}]} {
    %c16_i32 = arith.constant 16 : i32
    %0 = arith.muli %arg1, %c16_i32 : i32
    %1 = tpu.assume_multiple %0, 16 : i32
    %c0_i32 = arith.constant 0 : i32
    %2 = arith.cmpi eq, %arg1, %c0_i32 : i32
    %3 = arith.extui %2 : i1 to i32
    %c0_i32_0 = arith.constant 0 : i32
    %4 = arith.cmpi ne, %3, %c0_i32_0 : i32
    scf.if %4 {
      %c0_13 = arith.constant 0 : index
      %c0_14 = arith.constant 0 : index
      %c0_15 = arith.constant 0 : index
      %36 = vector.load %arg3[%c0_13, %c0_14, %c0_15] : memref<1x16x256xf32, #tpu.memory_space<vmem>>, vector<1x16x256xf32>
      %37 = vector.shape_cast %36 : vector<1x16x256xf32> to vector<16x256xf32>
      %38 = arith.truncf %37 : vector<16x256xf32> to vector<16x256xbf16>
      %c0_16 = arith.constant 0 : index
      %c0_17 = arith.constant 0 : index
      %39 = vector.load %arg5[%c0_16, %c0_17] : memref<16x256xbf16, #tpu.memory_space<vmem>>, vector<16x256xbf16>
      tpu.vector_store %arg5[%c0_16, %c0_17], %38 {strides = array<i32>} : memref<16x256xbf16, #tpu.memory_space<vmem>>, vector<16x256xbf16>,
    } else {
    }
    %c0 = arith.constant 0 : index
    %c0_1 = arith.constant 0 : index
    %5 = vector.load %arg5[%c0, %c0_1] : memref<16x256xbf16, #tpu.memory_space<vmem>>, vector<16x256xbf16>
    %6 = arith.index_cast %1 : i32 to index
    %c0_2 = arith.constant 0 : index
    %7 = vector.load %arg5[%6, %c0_2] : memref<16x256xbf16, #tpu.memory_space<vmem>>, vector<16x256xbf16>
    %cst = arith.constant dense<0.000000e+00> : vector<16x16xf32>
    %8 = tpu.matmul %7, %5, %cst {dimension_numbers = #tpu.dot_dimension_numbers<[1], [1], [0], [0], [0, 0, 1, 0], [], []>} : vector<16x256xbf16>, vector<16x256xbf16>, vector<16x16xf32> -> vector<16x16xf32>
    %9 = tpu.iota {dimensions = array<i32: 1>} : vector<16x16xi32>
    %c4_i32 = arith.constant 4 : i32
    %10 = vector.broadcast %c4_i32 : i32 to vector<16x16xi32>
    %11 = arith.cmpi slt, %9, %10 : vector<16x16xi32>
    %cst_3 = arith.constant 3.000000e+38 : f32
    %12 = vector.broadcast %cst_3 : f32 to vector<16x16xf32>
    %13 = arith.select %11, %8, %12 : vector<16x16xi1>, vector<16x16xf32>
    %cst_4 = arith.constant dense<0x7F800000> : vector<16xf32>
    %14 = vector.multi_reduction <minimumf>, %13, %cst_4 [1] : vector<16x16xf32> to vector<16xf32>
    %15 = vector.shape_cast %14 : vector<16xf32> to vector<16x1xf32>
    %16 = vector.broadcast %15 : vector<16x1xf32> to vector<16x16xf32>
    %17 = arith.subf %16, %13 : vector<16x16xf32>
    %18 = math.exp %17 : vector<16x16xf32>
    %cst_5 = arith.constant dense<0.000000e+00> : vector<16xf32>
    %19 = vector.multi_reduction <add>, %18, %cst_5 [1] : vector<16x16xf32> to vector<16xf32>
    %20 = vector.shape_cast %19 : vector<16xf32> to vector<16x1xf32>
    %21 = tpu.reciprocal %20 {approx = true} : vector<16x1xf32> -> vector<16x1xf32>
    %22 = vector.broadcast %21 : vector<16x1xf32> to vector<16x16xf32>
    %23 = arith.mulf %18, %22 : vector<16x16xf32>
    %24 = arith.truncf %23 : vector<16x16xf32> to vector<16x16xbf16>
    %cst_6 = arith.constant dense<0.000000e+00> : vector<16x256xf32>
    %25 = tpu.matmul %24, %5, %cst_6 {dimension_numbers = #tpu.dot_dimension_numbers<[1], [0], [0], [1], [0, 0, 1, 1], [], []>} : vector<16x16xbf16>, vector<16x256xbf16>, vector<16x256xf32> -> vector<16x256xf32>
    %c0_7 = arith.constant 0 : index
    %26 = arith.index_cast %1 : i32 to index
    %c0_8 = arith.constant 0 : index
    %27 = vector.load %arg3[%c0_7, %26, %c0_8] : memref<1x16x256xf32, #tpu.memory_space<vmem>>, vector<1x16x256xf32>
    %28 = vector.shape_cast %27 : vector<1x16x256xf32> to vector<16x256xf32>
    %c0_9 = arith.constant 0 : index
    %29 = memref.load %arg2[%c0_9] : memref<1xf32, #tpu.memory_space<smem>>
    %30 = vector.broadcast %29 : f32 to vector<16x256xf32>
    %31 = arith.mulf %30, %25 : vector<16x256xf32>
    %32 = arith.addf %31, %28 : vector<16x256xf32>
    %c0_10 = arith.constant 0 : index
    %c0_11 = arith.constant 0 : index
    %c0_12 = arith.constant 0 : index
    %33 = vector.load %arg4[%c0_10, %c0_11, %c0_12] : memref<1x16x256xf32, #tpu.memory_space<vmem>>, vector<1x16x256xf32>
    %34 = vector.shape_cast %33 : vector<1x16x256xf32> to vector<16x256xf32>
    %35 = vector.shape_cast %32 : vector<16x256xf32> to vector<1x16x256xf32>
    tpu.vector_store %arg4[%c0_10, %c0_11, %c0_12], %35 {strides = array<i32>} : memref<1x16x256xf32, #tpu.memory_space<vmem>>, vector<1x16x256xf32>,
    return
  }
  func.func @transform_0(%arg0: i32, %arg1: i32) -> i32 {
    %c0_i32 = arith.constant 0 : i32
    %c0_i32_0 = arith.constant 0 : i32
    return %c0_i32 : i32
  }
  func.func @transform_1(%arg0: i32, %arg1: i32) -> (i32, i32, i32) {
    %c0_i32 = arith.constant 0 : i32
    %c0_i32_0 = arith.constant 0 : i32
    %c0_i32_1 = arith.constant 0 : i32
    return %arg0, %c0_i32, %c0_i32_0 : i32, i32, i32
  }
  func.func @transform_2(%arg0: i32, %arg1: i32) -> (i32, i32, i32) {
    %c0_i32 = arith.constant 0 : i32
    %c0_i32_0 = arith.constant 0 : i32
    return %arg0, %arg1, %c0_i32 : i32, i32, i32
  }
}

</mosaic_0001>

<bundles_post_ra>
// kernel: tpu_custom_call.1
= control target key start
LH: loop header
LB: loop body
LE: loop exit
PB: predicated region body
PF: predicated region fallthrough
CT: control target
= control target key end

     0   :  { %s873_s0 = inlined_call_operand.<no memory space> [shape: f32[1], index: 0, kind: input, shape index: {}]   ;;  %s874_s1 = inlined_call_operand.hbm [shape: f32[2,16,256], index: 1, kind: input, shape index: {}]   ;;  %s875_s2 = inlined_call_operand.hbm [shape: f32[2,16,256], index: 2, kind: output, shape index: {}]  }
   0x1   :  { %7 = sst [smem:[#allocation3]] %s873_s0 }
   0x2   :  { %8 = vsyncpa [#allocation5], 0 }
   0x3   :  { %10 = vsyncpa [#allocation5 + $0x1], 0 }
   0x4   :  { %11 = vsyncpa [#allocation6], 0 }
   0x5   :  { %13 = vsyncpa [#allocation6 + $0x1], 0  ;;  %s677_s11 = smov 0   ;;  %s679_s12 = smov 0  }
   0x6   :  { %s681_s13 = smov 0   ;;  %s683_s14 = smov 0  }
   0x7   :  { %s685_s15 = smov 0   ;;  %s687_s16 = smov 0  }
   0x8 LB: > { %s445_s0 = sadd.s32 4294967295, %s650_s16   ;;  %s446_s17 = sadd.s32 4294967294, %s650_s16   ;;  %s650_s16 = sphi %s687_s16, %s19_s16   ;;  %s646_s15 = sphi %s685_s15, %s890_s15   ;;  %s642_s14 = sphi %s683_s14, %s889_s14   ;;  %s638_s13 = sphi %s681_s13, %s888_s13   ;;  %s634_s12 = sphi %s679_s12, %s887_s12   ;;  %s630_s11 = sphi %s677_s11, %s886_s11  }
   0x9   : > { %s31_s18 = sadd.s32 1, %s646_s15  ;;  %s59_s19 = sadd.s32 1, %s638_s13 }
   0xa   : > { %p33_p0 = scmp.ge.s32.totalorder %s31_s18, 2  ;;  %p66_p1 = scmp.ne.s32.totalorder %s638_s13, %s634_s12 }
   0xb   : > { %p67_p2 = scmp.eq.s32.totalorder %s650_s16, 0  ;;  %p72_p3 = scmp.ne.s32.totalorder %s634_s12, %s630_s11 }
   0xc   : > { %s892_s18 = smov (%p33_p0, %s31_s18), 0  ;;  %p73_p5 = scmp.eq.s32.totalorder %s445_s0, 0 }
   0xd   : > { %p718_p4 = por %p67_p2, %p66_p1  ;;  %s56_s21 = ssub.s32 %s646_s15, %s892_s18 }
   0xe   : > { %p98_p6 = scmp.eq.s32.totalorder %s445_s0, 1  ;;  %p57_p7 = scmp.eq.s32.totalorder %s56_s21, 0 }
   0xf   : > { %p724_p8 = por %p73_p5, %p72_p3  ;;  %p104_p10 = scmp.eq.s32.totalorder %s446_s17, 1 }
  0x10   : > { %p728_p9 = por %p98_p6, %p66_p1  ;;  %p475_p13 = scmp.lt.s32.totalorder %s650_s16, 2 }
  0x11   : > { %s733_s24 = scalar_select %p57_p7, %s638_s13, %s59_s19  }
  0x12   : > { %s879_s23 = scalar_select %p728_p9, 1, 0 }
  0x13   : > { %p735_p11 = por %p104_p10, %p72_p3  ;;  %s127_s26 = sand.u32 1, %s638_s13  }
  0x14   : > { %s449_s27 = sshll.u32 %s127_s26, 5  ;;  %s461_s28 = sshll.u32 %s646_s15, 9 }
  0x15   : > { %s880_s25 = scalar_select %p735_p11, 1, 0 }
  0x16   : > { %s746_s3 = scalar_lea.hbm %s874_s1, %s461_s28  ;;  %s131_s4 = scalar_lea.vmem [#allocation4], %s449_s27 }
  0x17   : > { %s138_s5 = sshll.u32 %s131_s4, 4  ;;  %p752_p0 = pnand %p475_p13, %p718_p4  ;;  %s748_s5 = int_to_ptr.vmem [resolvable:$true] %s138_s5 }
  0x18   : > { %s757_s7 = scalar_lea.sflag [#allocation5], %s127_s26  ;;  %s538_s8 = scalar_lea.hbm %s746_s3, 512 }
  0x19   : > { %p539_p2 = scmp.ne.s32.totalorder %s746_s3, %s538_s8  ;;  %p540_p3 = pneg %p752_p0 }
  0x1a   : > { %s543_s0 = scalar_lea.hbm %s874_s1, 1024  ;;  %p544_p4 = scmp.lt.u32.totalorder %s746_s3, %s874_s1 }
  0x1b   : > { %p541_p5 = pnand %p540_p3, %p539_p2  ;;  %p545_p7 = scmp.lt.u32.totalorder %s543_s0, %s538_s8 }
  0x1c   : > { %p547_p13 = scmp.lt.u32.totalorder %s538_s8, %s746_s3 }
  0x1d   : > { %p542_p6 = pneg %p541_p5  ;;  %p546_p10 = por %p545_p7, %p544_p4 }
  0x1f   : > { %p548_p12 = por %p547_p13, %p546_p10 }
  0x21   : > { %p549_p1 = pnand %p548_p12, %p542_p6 }
  0x23   : > { %552 = shalt.err (!%p549_p1)
}
  0x24   : > { %s553_s20 = scalar_lea.vmem %s748_s5, 512  ;;  %s652_s21 = smov [#allocation4]  }
  0x25   : > { %p554_p2 = scmp.ne.s32.totalorder %s748_s5, %s553_s20  ;;  %s558_s26 = sshll.u32 %s652_s21, 4  ;;  %s559_s26 = int_to_ptr.vmem [resolvable:$false] %s558_s26 }
  0x26   : > { %s560_s27 = scalar_lea.vmem %s559_s26, 1024  ;;  %p561_p9 = scmp.lt.s32.totalorder %s748_s5, %s559_s26 }
  0x27   : > { %p556_p5 = pnand %p554_p2, %p540_p3  ;;  %p562_p4 = scmp.lt.s32.totalorder %s560_s27, %s553_s20 }
  0x29   : > { %p557_p11 = pneg %p556_p5  ;;  %p563_p7 = por %p562_p4, %p561_p9 }
  0x2b   : > { %p564_p10 = pnand %p563_p7, %p557_p11 }
  0x2d   : > { %567 = shalt.err (!%p564_p10)
}
  0x2e   : > { %s653_s28 = smov 256   ;;  %s654_s29 = smov 16  }
  0x2f   : > { %470 = dma.hbm_to_vmem [thread:$0]  (!%p752_p0), %s746_s3, 512, %s748_s5, %s757_s7, %s653_s28, %s653_s28, %s654_s29  }
  0x30   : > { %p146_p12 = scmp.lt.s32.totalorder %s650_s16, 3  ;;  %p882_p1 = scmp.ge.s32.totalorder %s650_s16, 1 }
  0x32   : > { %p147_p3 = pnand %p882_p1, %p146_p12 }
  0x33   : > { %s789_s30 = sand.u32 (!%p147_p3), 1, %s634_s12  }
  0x34   : > { %150 = sbr.rel (%p147_p3) target bundleno = 838 (0x346), region = 28  ;;  %s453_s4 = sshll.u32 (!%p147_p3), %s789_s30, 5 }
  0x35   : > { %s153_s8 = scalar_lea.sflag (!%p147_p3), [#allocation5], %s789_s30  ;;  %s156_s9 = scalar_lea.vmem (!%p147_p3), [#allocation4], %s453_s4 }
  0x3b   : > { %621 = dma.done.wait (%p724_p8), %s153_s8, 512  }
  0x3c   : > { %623 = vsyncadd (%p724_p8), %s153_s8, 4294966784  ;;  %v799_v0 = vld [vmem:[%s156_s9 + $0x8] sm:$0xff]  ;;  %v801_v1 = vld [vmem:[%s156_s9 + $0x18] sm:$0xff]  ;;  %v242_v6 = vlaneseq  ;;  %vm247_vm1 = vcmask 130048   ;;  %v655_v26 = vmov 0   ;;  %s326_s22 = sld [smem:[#allocation3]] }
  0x3d   : > { %v184_v2 = vld [vmem:[%s156_s9] sm:$0xff]  ;;  %v189_v3 = vpack.c.bf16 %v801_v1, %v799_v0  ;;  %v805_v4 = vld [vmem:[%s156_s9 + $0x10] sm:$0xff]  ;;  %306 = vmatprep.mubr.bf16.mxu1 %v655_v26  ;;  %s176_s3 = scalar_lea.vmem [#allocation7], %s453_s4  ;;  %s462_s6 = sshll.u32 %s642_s14, 9 }
  0x3e   : > { %v188_v5 = vpack.c.bf16 %v805_v4, %v184_v2  ;;  %v243_v7 = vand.u32 127, %v242_v6  ;;  %s357_s5 = sshll.u32 %s176_s3, 4  ;;  %s823_s0 = scalar_lea.hbm %s875_s2, %s462_s6  ;;  %s816_s5 = int_to_ptr.vmem [resolvable:$true] %s357_s5 }
  0x3f   : > { %201 = vmatprep.subr.bf16.mxu0 %v189_v3  ;;  %233 = vmatprep.mubr.bf16.mxu0 %v189_v3  ;;  %s341_s14 = scalar_lea.sflag [#allocation6], %s789_s30  ;;  %s568_s17 = scalar_lea.vmem %s816_s5, 512 }
  0x40   : > { %202 = vmatpush1.bf16.xpose.msra.mxu0 %v188_v5  ;;  %274 = vmatprep.subr.bf16.mxu1 %v189_v3  ;;  %vm244_vm0 = vcmp.lt.s32.totalorder %v243_v7, 4  ;;  %p569_p8 = scmp.ne.s32.totalorder %s816_s5, %s568_s17  ;;  %p883_p9 = scmp.ne.s32.totalorder %s879_s23, 0 }
  0x41   : > { %275 = vmatpush1.bf16.msra.mxu1 %v188_v5  ;;  %s656_s19 = smov [#allocation7]  }
  0x42   : > { %v327_v34 = vstv %s326_s22  ;;  %p570_p11 = pnand %p569_p8, %p883_p9  ;;  %s572_s20 = sshll.u32 %s656_s19, 4  ;;  %s573_s20 = int_to_ptr.vmem [resolvable:$false] %s572_s20 }
  0x43   : > { %s574_s21 = scalar_lea.vmem %s573_s20, 1024  ;;  %p575_p6 = scmp.lt.s32.totalorder %s816_s5, %s573_s20 }
  0x44   : > { %p571_p0 = pneg %p570_p11  ;;  %p576_p13 = scmp.lt.s32.totalorder %s574_s21, %s568_s17 }
  0x46   : > { %p577_p2 = por %p576_p13, %p575_p6 }
  0x47   : > { %234 = vmatmul.mubr.bf16.vlgmr.msra.gmra.mrb[0].mxu0 %v188_v5 }
  0x48   : > { %p578_p5 = pnand %p577_p2, %p571_p0 }
 0x11a   : > { %v235_v8 = vpop.f32.mrb[0].mxu0 }
 0x11b   : > { %v245_v9 = vsel %vm244_vm0, %v235_v8, 3e+38  ;;  %v237_v10 = vpop.f32.mrb[1].mxu0 }
 0x11c   : > { %v238_v11 = vpop.f32.mrb[2].mxu0  ;;  %v248_v12 = vsel %vm247_vm1, %v245_v9, inf }
 0x11d   : > { %v246_v13 = vsel %vm244_vm0, %v238_v11, 3e+38  ;;  %249 = vmin.xlane.f32.xlu0 %v248_v12  ;;  %v240_v14 = vpop.f32.mrb[3].mxu0 }
 0x11e   : > { %v251_v15 = vsel %vm247_vm1, %v246_v13, inf }
 0x121   : > { %252 = vmin.xlane.f32.xlu0 %v251_v15 }
 0x1aa   : > { %v250_v16 = vpop.xlane.xlu0 %249 }
 0x1ab   : > { %v254_v17 = vsub.f32 %v250_v16, %v245_v9 }
 0x1ad   : > { %v256_v18 = vmul.f32 1.442695, %v254_v17 }
 0x1ae   : > { %v253_v19 = vpop.xlane.xlu0 %252 }
 0x1af   : > { %530 = vpow2.f32 %v256_v18  ;;  %v255_v20 = vsub.f32 %v253_v19, %v246_v13 }
 0x1b1   : > { %v258_v21 = vmul.f32 1.442695, %v255_v20 }
 0x1b3   : > { %532 = vpow2.f32 %v258_v21 }
 0x1b9   : > { %v531_v22 = vpop.eup %530 }
 0x1ba   : > { %v260_v23 = vsel %vm247_vm1, %v531_v22, 0.0 }
 0x1bb   : > { %261 = vadd.xlane.f32.xlu1 %v260_v23 }
 0x1bd   : > { %v533_v24 = vpop.eup %532 }
 0x1be   : > { %v263_v25 = vsel %vm247_vm1, %v533_v24, 0.0 }
 0x1bf   : > { %264 = vadd.xlane.f32.xlu1 %v263_v25 }
 0x248   : > { %v262_v27 = vpop.xlane.xlu1 %261 }
 0x249   : > { %534 = vrcp.f32 %v262_v27 }
 0x24c   : > { %v265_v28 = vpop.xlane.xlu1 %264 }
 0x24d   : > { %536 = vrcp.f32 %v265_v28 }
 0x253   : > { %v535_v29 = vpop.eup %534 }
 0x254   : > { %v268_v31 = vmul.f32 %v535_v29, %v531_v22 }
 0x257   : > { %v537_v30 = vpop.eup %536 }
 0x258   : > { %v269_v32 = vmul.f32 %v537_v30, %v533_v24 }
 0x25a   : > { %v270_v33 = vpack.c.bf16 %v269_v32, %v268_v31 }
 0x25c   : > { %455 = vmatmul.mubr.msk.bf16.vlgmr.msra.gmra.mrb[0].mxu1 %vm247_vm1, %v270_v33 }
 0x32f   : > { %v308_v35 = vpop.f32.mrb[0].mxu1 }
 0x330   : > { %v328_v36 = vmul.f32 %v327_v34, %v308_v35  ;;  %v310_v37 = vpop.f32.mrb[1].mxu1 }
 0x331   : > { %v329_v38 = vmul.f32 %v327_v34, %v310_v37  ;;  %v312_v39 = vpop.f32.mrb[2].mxu1 }
 0x332   : > { %v332_v40 = vadd.f32 %v328_v36, %v184_v2  ;;  %v330_v41 = vmul.f32 %v327_v34, %v312_v39  ;;  %v314_v42 = vpop.f32.mrb[3].mxu1 }
 0x333   : > { %v333_v43 = vadd.f32 %v329_v38, %v799_v0  ;;  %v331_v44 = vmul.f32 %v327_v34, %v314_v42 }
 0x334   : > { %336 = vst [vmem:[%s176_s3] sm:$0xff] %v332_v40  ;;  %v334_v45 = vadd.f32 %v330_v41, %v805_v4 }
 0x335   : > { %337 = vst [vmem:[%s176_s3 + $0x8] sm:$0xff] %v333_v43  ;;  %v335_v46 = vadd.f32 %v331_v44, %v801_v1 }
 0x336   : > { %338 = vst [vmem:[%s176_s3 + $0x10] sm:$0xff] %v334_v45 }
 0x337   : > { %339 = vst [vmem:[%s176_s3 + $0x18] sm:$0xff] %v335_v46 }
 0x338   : > { %581 = shalt.err (!%p578_p5)
}
 0x339   : > { %s582_s26 = scalar_lea.hbm %s823_s0, 512  ;;  %s586_s29 = scalar_lea.hbm %s875_s2, 1024 }
 0x33a   : > { %p583_p4 = scmp.ne.s32.totalorder %s823_s0, %s582_s26  ;;  %p587_p12 = scmp.lt.u32.totalorder %s823_s0, %s875_s2 }
 0x33b   : > { %p588_p1 = scmp.lt.u32.totalorder %s586_s29, %s582_s26  ;;  %p590_p8 = scmp.lt.u32.totalorder %s582_s26, %s823_s0 }
 0x33c   : > { %p584_p7 = pnand %p583_p4, %p883_p9 }
 0x33d   : > { %p589_p3 = por %p588_p1, %p587_p12 }
 0x33e   : > { %p585_p10 = pneg %p584_p7 }
 0x33f   : > { %p591_p11 = por %p590_p8, %p589_p3 }
 0x341   : > { %p592_p0 = pnand %p591_p11, %p585_p10 }
 0x343   : > { %595 = shalt.err (!%p592_p0)
}
 0x344   : > { %s657_s9 = smov 256   ;;  %s658_s22 = smov 16  }
 0x345   : > { %465 = dma.vmem_to_hbm [thread:$0]  (%p883_p9), %s816_s5, 512, %s823_s0, %s341_s14, %s657_s9, %s657_s9, %s658_s22  }
 0x346 PF: > { %s372_s3 = sand.u32 1, %s630_s11   ;;  %p884_p6 = scmp.ne.s32.totalorder %s880_s25, 0 }
 0x347   : > { %p885_p13 = scmp.ge.s32.totalorder %s650_s16, 2  ;;  %s373_s6 = scalar_lea.sflag [#allocation6], %s372_s3 }
 0x349   : > { %p472_p2 = pnand %p885_p13, %p884_p6 }
 0x34b   : > { %625 = dma.done.wait (!%p472_p2), %s373_s6, 512  }
 0x34c   : > { %627 = vsyncadd (!%p472_p2), %s373_s6, 4294966784  ;;  %s19_s16 = sadd.s32 1, %s650_s16   ;;  %s886_s11 = smov %s634_s12 }
 0x34d   : > { %p16_p5 = scmp.ge.s32.totalorder %s19_s16, 4   ;;  %s887_s12 = smov %s638_s13 }
 0x34e   : > { %s888_s13 = smov %s733_s24  ;;  %s889_s14 = smov %s646_s15 }
 0x34f   : > { %s890_s15 = smov %s892_s18  ;;  %18 = sbr.rel (!%p16_p5) target bundleno = 8 (0x8), region = 79 }
 0x356   :  { %378 = vsyncpa [#allocation5], 1 }
 0x357   :  { %380 = vsyncpa [#allocation5 + $0x1], 1 }
 0x358   :  { %381 = vsyncpa [#allocation6], 1 }
 0x359   :  { %383 = vsyncpa [#allocation6 + $0x1], 1 }

</bundles_post_ra>
